<compile_context>
chip_gen: v7x
topology: tpu7x:2x2x1
jax: 0.10.0
libtpu: 0.0.40
codegen_flags: <defaults>
</compile_context>

<pallas_src>
import jax
import jax.numpy as jnp
from jax.experimental import pallas as pl
from jax.experimental.pallas import tpu as pltpu


def _fully2net_kernel(x_ref, w1_ref, w2_ref, out_ref):
    """out = relu(x @ w1) @ w2 for one (tm, in_features) row tile."""
    h = jnp.dot(x_ref[...], w1_ref[...], preferred_element_type=jnp.float32)
    h = jnp.maximum(h, 0.0)                                    # fused ReLU (VPU)
    out = jnp.dot(h, w2_ref[...], preferred_element_type=jnp.float32)
    out_ref[...] = out.astype(out_ref.dtype)


def fully2net_forward(x, adj_hat, w1, w2, *, block_rows=256):
    """Pallas implementation of Fully2Net.forward(x, adj_hat).

    x:       (in_features, *rest)  -> flattened + transposed to (M, in_features)
    adj_hat: unused by the reference module's forward (accepted for parity)
    w1:      (num_hidden, in_features)   nn.Linear weight layout
    w2:      (num_classes, num_hidden)
    returns: (M, num_classes)
    """
    del adj_hat  # the PyTorch module never uses it in forward()

    in_features = x.shape[0]
    xt = jnp.reshape(x, (in_features, -1)).T            # (M, in_features)
    m = xt.shape[0]

    num_hidden = w1.shape[0]
    num_classes = w2.shape[0]

    w1t = w1.T                                           # (in_features, num_hidden)
    # Lane-dense output slab: zero-pad class dim up to a multiple of 128.
    c_pad = ((num_classes + 127) // 128) * 128
    w2t = jnp.zeros((num_hidden, c_pad), w2.dtype).at[:, :num_classes].set(w2.T)

    # Row tiling over the node dim (full-array block when it already fits).
    if m <= block_rows:
        tm, m_pad = m, m
    else:
        tm = block_rows
        m_pad = ((m + tm - 1) // tm) * tm
    if m_pad != m:
        xt = jnp.zeros((m_pad, in_features), xt.dtype).at[:m, :].set(xt)

    out_padded = pl.pallas_call(
        _fully2net_kernel,
        out_shape=jax.ShapeDtypeStruct((m_pad, c_pad), jnp.float32),
        grid=(m_pad // tm,),
        in_specs=[
            pl.BlockSpec((tm, in_features), lambda i: (i, 0)),        # x row tile
            pl.BlockSpec((in_features, num_hidden), lambda i: (0, 0)),  # w1 (resident)
            pl.BlockSpec((num_hidden, c_pad), lambda i: (0, 0)),        # w2 (resident)
        ],
        out_specs=pl.BlockSpec((tm, c_pad), lambda i: (i, 0)),
        compiler_params=pltpu.CompilerParams(
            dimension_semantics=("parallel",)),
    )(xt, w1t, w2t)

    return out_padded[:m, :num_classes]


if __name__ == "__main__":
    IN_FEATURES, NUM_HIDDEN, NUM_CLASSES = 32, 32, 8
    H, W = 8, 8                      # x spatial dims -> M = 64 "nodes"
    M = H * W

    key = jax.random.PRNGKey(0)
    kx, ka, k1, k2 = jax.random.split(key, 4)

    x = jax.random.normal(kx, (IN_FEATURES, H, W), jnp.float32)
    adj_hat = (jax.random.uniform(ka, (M, M)) < 0.2).astype(jnp.float32)  # unused by forward

    # nn.Linear-style init: U(-1/sqrt(fan_in), +1/sqrt(fan_in)), bias=False
    s1 = 1.0 / (IN_FEATURES ** 0.5)
    s2 = 1.0 / (NUM_HIDDEN ** 0.5)
    w1 = jax.random.uniform(k1, (NUM_HIDDEN, IN_FEATURES), jnp.float32, -s1, s1)
    w2 = jax.random.uniform(k2, (NUM_CLASSES, NUM_HIDDEN), jnp.float32, -s2, s2)

    out = jax.jit(fully2net_forward)(x, adj_hat, w1, w2)
    jax.block_until_ready(out)

    # Pure-JAX reference check (exact same f32 math path).
    xt_ref = x.reshape(IN_FEATURES, -1).T
    ref = jnp.maximum(xt_ref @ w1.T, 0.0) @ w2.T
    assert out.shape == (M, NUM_CLASSES)
    assert jnp.allclose(out, ref, atol=1e-5, rtol=1e-5)
    print("KERNEL_OK")
</pallas_src>

<mosaic_0001>
module attributes {stable_mosaic.version = 11 : i64} {
  func.func @_fully2net_kernel(%arg0: i32, %arg1: memref<64x32xf32, #tpu.memory_space<vmem>>, %arg2: memref<32x32xf32, #tpu.memory_space<vmem>>, %arg3: memref<32x128xf32, #tpu.memory_space<vmem>>, %arg4: memref<64x128xf32, #tpu.memory_space<vmem>>) attributes {dimension_semantics = [#tpu.dimension_semantics<parallel>], iteration_bounds = array<i64: 1>, scalar_prefetch = 0 : i64, scratch_operands = 0 : i64, tpu.core_type = #tpu.core_type<tc>, window_params = [{transform_indices = @transform_0, window_bounds = array<i64: 64, 32>}, {pipeline_mode = #tpu.pipeline_mode<synchronous>, transform_indices = @transform_1, window_bounds = array<i64: 32, 32>}, {pipeline_mode = #tpu.pipeline_mode<synchronous>, transform_indices = @transform_2, window_bounds = array<i64: 32, 128>}, {transform_indices = @transform_3, window_bounds = array<i64: 64, 128>}]} {
    %c0 = arith.constant 0 : index
    %c0_0 = arith.constant 0 : index
    %0 = vector.load %arg1[%c0, %c0_0] : memref<64x32xf32, #tpu.memory_space<vmem>>, vector<64x32xf32>
    %c0_1 = arith.constant 0 : index
    %c0_2 = arith.constant 0 : index
    %1 = vector.load %arg2[%c0_1, %c0_2] : memref<32x32xf32, #tpu.memory_space<vmem>>, vector<32x32xf32>
    %cst = arith.constant dense<0.000000e+00> : vector<64x32xf32>
    %2 = tpu.matmul %0, %1, %cst {dimension_numbers = #tpu.dot_dimension_numbers<[1], [0], [0], [1], [0, 0, 1, 1], [], []>} : vector<64x32xf32>, vector<32x32xf32>, vector<64x32xf32> -> vector<64x32xf32>
    %cst_3 = arith.constant 0.000000e+00 : f32
    %3 = vector.broadcast %cst_3 : f32 to vector<64x32xf32>
    %4 = arith.maximumf %2, %3 : vector<64x32xf32>
    %c0_4 = arith.constant 0 : index
    %c0_5 = arith.constant 0 : index
    %5 = vector.load %arg3[%c0_4, %c0_5] : memref<32x128xf32, #tpu.memory_space<vmem>>, vector<32x128xf32>
    %cst_6 = arith.constant dense<0.000000e+00> : vector<64x128xf32>
    %6 = tpu.matmul %4, %5, %cst_6 {dimension_numbers = #tpu.dot_dimension_numbers<[1], [0], [0], [1], [0, 0, 1, 1], [], []>} : vector<64x32xf32>, vector<32x128xf32>, vector<64x128xf32> -> vector<64x128xf32>
    %c0_7 = arith.constant 0 : index
    %c0_8 = arith.constant 0 : index
    %7 = vector.load %arg4[%c0_7, %c0_8] : memref<64x128xf32, #tpu.memory_space<vmem>>, vector<64x128xf32>
    tpu.vector_store %arg4[%c0_7, %c0_8], %6 {strides = array<i32>} : memref<64x128xf32, #tpu.memory_space<vmem>>, vector<64x128xf32>,
    return
  }
  func.func @transform_0(%arg0: i32) -> (i32, i32) {
    %c0_i32 = arith.constant 0 : i32
    %c0_i32_0 = arith.constant 0 : i32
    return %arg0, %c0_i32 : i32, i32
  }
  func.func @transform_1(%arg0: i32) -> (i32, i32) {
    %c0_i32 = arith.constant 0 : i32
    %c0_i32_0 = arith.constant 0 : i32
    %c0_i32_1 = arith.constant 0 : i32
    return %c0_i32, %c0_i32_0 : i32, i32
  }
  func.func @transform_2(%arg0: i32) -> (i32, i32) {
    %c0_i32 = arith.constant 0 : i32
    %c0_i32_0 = arith.constant 0 : i32
    %c0_i32_1 = arith.constant 0 : i32
    return %c0_i32, %c0_i32_0 : i32, i32
  }
  func.func @transform_3(%arg0: i32) -> (i32, i32) {
    %c0_i32 = arith.constant 0 : i32
    %c0_i32_0 = arith.constant 0 : i32
    return %arg0, %c0_i32 : i32, i32
  }
}

</mosaic_0001>

<bundles_post_ra>
// kernel: fully2net_forward.1
= control target key start
LH: loop header
LB: loop body
LE: loop exit
PB: predicated region body
PF: predicated region fallthrough
CT: control target
= control target key end

     0   :  { %vm26_vm0 = vcmask 261120   ;;  %s513_s1 = inlined_call_operand.vmem [shape: f32[32,32], index: 1, kind: input, shape index: {}]   ;;  %s514_s0 = inlined_call_operand.vmem [shape: f32[64,32], index: 0, kind: input, shape index: {}]   ;;  %s515_s2 = inlined_call_operand.vmem [shape: f32[32,128], index: 2, kind: input, shape index: {}]   ;;  %s516_s3 = inlined_call_operand.vmem [shape: f32[64,128], index: 3, kind: output, shape index: {}]  }
   0x1   :  { %v22_v0 = vld [vmem:[%s513_s1] sm:$0xff]  ;;  %v23_v1 = vld [vmem:[%s513_s1 + $0x8] sm:$0xff]  ;;  %v24_v2 = vld [vmem:[%s513_s1 + $0x10] sm:$0xff] }
   0x2   :  { %v389_v3 = vpack.c.bf16 %v23_v1, %v22_v0  ;;  %v25_v4 = vld [vmem:[%s513_s1 + $0x18] sm:$0xff]  ;;  %v14_v5 = vld [vmem:[%s514_s0] sm:$0xff]  ;;  %v165_v8 = vld [vmem:[%s515_s2 + $0x8] sm:$0xff] }
   0x3   :  { %v393_v6 = vpack.c.bf16 %v25_v4, %v24_v2  ;;  %357 = vmatprep.mubr.msk.f32.mxu0 %vm26_vm0, %v14_v5  ;;  %v164_v7 = vld [vmem:[%s515_s2] sm:$0xff]  ;;  %v15_v10 = vld [vmem:[%s514_s0 + $0x8] sm:$0xff]  ;;  %v16_v11 = vld [vmem:[%s514_s0 + $0x10] sm:$0xff] }
   0x4   :  { %390 = vmatprep.subr.bf16.mxu0 %v389_v3  ;;  %v397_v9 = vpack.c.bf16 %v165_v8, %v164_v7  ;;  %v17_v12 = vld [vmem:[%s514_s0 + $0x18] sm:$0xff]  ;;  %v18_v13 = vld [vmem:[%s514_s0 + $0x20] sm:$0xff]  ;;  %v19_v14 = vld [vmem:[%s514_s0 + $0x28] sm:$0xff] }
   0x5   :  { %392 = vmatpush3.bf16.msra.mxu0 %v389_v3  ;;  %v20_v15 = vld [vmem:[%s514_s0 + $0x30] sm:$0xff]  ;;  %v21_v16 = vld [vmem:[%s514_s0 + $0x38] sm:$0xff] }
   0x6   :  { %394 = vmatprep.subr.bf16.mxu0 %v393_v6  ;;  %398 = vmatprep.subr.bf16.mxu1 %v397_v9  ;;  %v166_v17 = vld [vmem:[%s515_s2 + $0x10] sm:$0xff]  ;;  %v167_v18 = vld [vmem:[%s515_s2 + $0x18] sm:$0xff] }
   0x7   :  { %400 = vmatpush3.bf16.msra.mxu1 %v397_v9  ;;  %v401_v19 = vpack.c.bf16 %v167_v18, %v166_v17 }
   0x9   :  { %396 = vmatpush3.bf16.msra.mxu0 %v393_v6  ;;  %402 = vmatprep.subr.bf16.mxu1 %v401_v19 }
   0xb   :  { %404 = vmatpush3.bf16.msra.mxu1 %v401_v19 }
   0xc   :  { %358 = vmatmul.mubr.msk.f32.vlgmr.msra.gmra.mrb[0].mxu0 %vm26_vm0, %v15_v10 }
   0xd   :  { %360 = vmatprep.mubr.msk.f32.mxu0 %vm26_vm0, %v16_v11 }
  0x10   :  { %361 = vmatmul.mubr.msk.f32.gmra.mrb[2].mxu0 %vm26_vm0, %v17_v12 }
  0x11   :  { %363 = vmatprep.mubr.msk.f32.mxu0 %vm26_vm0, %v18_v13 }
  0x14   :  { %364 = vmatmul.mubr.msk.f32.gmra.mrb[4].mxu0 %vm26_vm0, %v19_v14 }
  0x15   :  { %366 = vmatprep.mubr.msk.f32.mxu0 %vm26_vm0, %v20_v15 }
  0x18   :  { %367 = vmatmul.mubr.msk.f32.gmra.mrb[6].mxu0 %vm26_vm0, %v21_v16 }
  0xdf   :  { %v359_v20 = vpop.f32.mrb[0].mxu0 }
  0xe0   :  { %v117_v21 = vpop.f32.mrb[1].mxu0  ;;  %v157_v23 = vmax.f32 %v359_v20, 0.0 }
  0xe1   :  { %v156_v22 = vmax.f32 %v117_v21, 0.0 }
  0xe3   :  { %v362_v24 = vpop.f32.mrb[2].mxu0  ;;  %377 = vmatprep.mubr.msk.f32.mxu1 %vm26_vm0, %v156_v22 }
  0xe4   :  { %v127_v25 = vpop.f32.mrb[3].mxu0  ;;  %378 = vmatmul.mubr.msk.f32.vlgmr.msra.gmra.mrb[0].mxu1 %vm26_vm0, %v157_v23  ;;  %v159_v27 = vmax.f32 %v362_v24, 0.0 }
  0xe5   :  { %v158_v26 = vmax.f32 %v127_v25, 0.0 }
  0xe7   :  { %v365_v28 = vpop.f32.mrb[4].mxu0  ;;  %380 = vmatprep.mubr.msk.f32.mxu1 %vm26_vm0, %v158_v26 }
  0xe8   :  { %v137_v29 = vpop.f32.mrb[5].mxu0  ;;  %381 = vmatmul.mubr.msk.f32.gmra.mrb[2].mxu1 %vm26_vm0, %v159_v27  ;;  %v161_v31 = vmax.f32 %v365_v28, 0.0 }
  0xe9   :  { %v160_v30 = vmax.f32 %v137_v29, 0.0 }
  0xeb   :  { %v368_v32 = vpop.f32.mrb[6].mxu0  ;;  %383 = vmatprep.mubr.msk.f32.mxu1 %vm26_vm0, %v160_v30 }
  0xec   :  { %v147_v33 = vpop.f32.mrb[7].mxu0  ;;  %384 = vmatmul.mubr.msk.f32.gmra.mrb[4].mxu1 %vm26_vm0, %v161_v31  ;;  %v163_v35 = vmax.f32 %v368_v32, 0.0 }
  0xed   :  { %v162_v34 = vmax.f32 %v147_v33, 0.0 }
  0xef   :  { %386 = vmatprep.mubr.msk.f32.mxu1 %vm26_vm0, %v162_v34 }
  0xf0   :  { %387 = vmatmul.mubr.msk.f32.gmra.mrb[6].mxu1 %vm26_vm0, %v163_v35 }
 0x1b7   :  { %v379_v36 = vpop.f32.mrb[0].mxu1 }
 0x1b8   :  { %298 = vst [vmem:[%s516_s3 + $0x8] sm:$0xff] %v379_v36  ;;  %v258_v37 = vpop.f32.mrb[1].mxu1 }
 0x1b9   :  { %297 = vst [vmem:[%s516_s3] sm:$0xff] %v258_v37 }
 0x1bb   :  { %v382_v38 = vpop.f32.mrb[2].mxu1 }
 0x1bc   :  { %300 = vst [vmem:[%s516_s3 + $0x18] sm:$0xff] %v382_v38  ;;  %v268_v39 = vpop.f32.mrb[3].mxu1 }
 0x1bd   :  { %299 = vst [vmem:[%s516_s3 + $0x10] sm:$0xff] %v268_v39 }
 0x1bf   :  { %v385_v40 = vpop.f32.mrb[4].mxu1 }
 0x1c0   :  { %302 = vst [vmem:[%s516_s3 + $0x28] sm:$0xff] %v385_v40  ;;  %v278_v41 = vpop.f32.mrb[5].mxu1 }
 0x1c1   :  { %301 = vst [vmem:[%s516_s3 + $0x20] sm:$0xff] %v278_v41 }
 0x1c3   :  { %v388_v42 = vpop.f32.mrb[6].mxu1 }
 0x1c4   :  { %304 = vst [vmem:[%s516_s3 + $0x38] sm:$0xff] %v388_v42  ;;  %v288_v43 = vpop.f32.mrb[7].mxu1 }
 0x1c5   :  { %303 = vst [vmem:[%s516_s3 + $0x30] sm:$0xff] %v288_v43 }

</bundles_post_ra>
